<compile_context>
chip_gen: v5e
topology: v5e:2x2
jax: 0.10.0
libtpu: 0.0.40
codegen_flags: <defaults>
</compile_context>

<pallas_src>
import jax
import jax.numpy as jnp
import numpy as np
from jax.experimental import pallas as pl
from jax.experimental.pallas import tpu as pltpu


def _proj_kernel(x_ref, w_ref, b_ref, o_ref):
    # x_ref: (TM, Kp)   packed, lane-dense pixel tile
    # w_ref: (Kp, Ep)   (block-diagonal) weight, VMEM-resident across steps
    # b_ref: (1, Ep)    (R-tiled) f32 bias, VMEM-resident
    # o_ref: (TM, Ep)   packed embedding tile
    acc = jnp.dot(x_ref[...], w_ref[...], preferred_element_type=jnp.float32)
    o_ref[...] = (acc + b_ref[...]).astype(o_ref.dtype)


def _round_up(n, m):
    return ((n + m - 1) // m) * m


def _cdiv(a, b):
    return (a + b - 1) // b


def spectrum_range_projection(x, weight, bias=None, *, tile_m=4096,
                              out_dtype=None,
                              vmem_budget_bytes=32 * 1024 * 1024,
                              xla_fallback_bytes=0):
    """Pallas equivalent of SpectrumRangeProjection.forward.

    x:       any shape whose total size is a multiple of nb_pixels; flattened
             to [N, nb_pixels] exactly like x.view(-1, nb_pixels).
    weight:  [embed_dim, nb_pixels]  (PyTorch nn.Linear weight layout).
    bias:    [embed_dim] or None.
    tile_m:  pixel-row tile measured in *flattened* rows (rounded internally).
    out_dtype: output dtype (default x.dtype); bf16 halves HBM write traffic.
    xla_fallback_bytes: if the output is smaller than this, skip the Pallas
             call and let XLA fuse a plain dot (tiny-N launch overhead,
             single-TC on v7x).  0 disables the fallback.
    returns [N, embed_dim].
    """
    embed_dim, nb_pixels = weight.shape
    total = int(np.prod(x.shape))
    assert total % nb_pixels == 0, "input size must be a multiple of nb_pixels"
    n_rows = total // nb_pixels

    out_dtype = jnp.dtype(x.dtype if out_dtype is None else out_dtype)
    compute_dtype = jnp.dtype(x.dtype)
    out_itemsize = out_dtype.itemsize
    x_itemsize = compute_dtype.itemsize

    x_flat = x.reshape(n_rows, nb_pixels)               # view-like, no transpose
    w_t = jnp.transpose(weight).astype(compute_dtype)   # tiny [K, E], one time
    if bias is None:
        bias_f32 = jnp.zeros((embed_dim,), dtype=jnp.float32)
    else:
        bias_f32 = bias.astype(jnp.float32)

    # --- tiny-N fallback: launch/priming overhead dominates ----------------
    if n_rows * embed_dim * out_itemsize <= xla_fallback_bytes:
        y = jnp.dot(x_flat, w_t, preferred_element_type=jnp.float32)
        return (y + bias_f32[None, :]).astype(out_dtype)

    # --- R-row repack: kill the lane padding of the small-K input ----------
    if nb_pixels <= 128 and 128 % nb_pixels == 0:
        R = 128 // nb_pixels
    else:
        R = 1  # odd patch sizes: fall back to the plain [N,K]@[K,E] layout
    n_pad_rows = _round_up(n_rows, R)
    if n_pad_rows != n_rows:
        # Padded rows only affect their own (dropped) output rows.
        x_flat = jnp.pad(x_flat, ((0, n_pad_rows - n_rows), (0, 0)))
    n_packed = n_pad_rows // R
    k_cols = R * nb_pixels
    out_cols = R * embed_dim

    x_packed = x_flat.reshape(n_packed, k_cols)          # same HBM layout (view)
    if R > 1:
        w_blk = jnp.kron(jnp.eye(R, dtype=compute_dtype), w_t)   # [R*K, R*E]
        b_blk = jnp.tile(bias_f32, R).reshape(1, out_cols)
    else:
        w_blk = w_t
        b_blk = bias_f32.reshape(1, out_cols)

    # --- tile choice: big tiles (amortize ~0.35us/step), VMEM-budgeted -----
    tm_p = max(8, _round_up(max(tile_m // R, 1), 8))
    tm_p = min(tm_p, max(8, _round_up(n_packed, 8)))
    # make sure both TensorCores (megacore / v7x) get at least one grid step
    if n_packed > 8:
        tm_p = min(tm_p, max(8, _round_up(_cdiv(n_packed, 2), 8)))
    # shrink until the double-buffered working set fits the scoped budget
    row_bytes = (_round_up(k_cols, 128) * x_itemsize
                 + _round_up(out_cols, 128) * out_itemsize)
    fixed_bytes = (2 * _round_up(k_cols, 128) * _round_up(out_cols, 128)
                   * x_itemsize + 2 * _round_up(out_cols, 128) * 4)
    while tm_p > 8 and 2 * tm_p * row_bytes + fixed_bytes > vmem_budget_bytes:
        tm_p = max(8, _round_up(tm_p // 2, 8))

    grid = (pl.cdiv(n_packed, tm_p),)

    cost = pl.CostEstimate(
        flops=2 * n_rows * nb_pixels * embed_dim,
        transcendentals=0,
        bytes_accessed=(n_rows * nb_pixels * x_itemsize
                        + n_rows * embed_dim * out_itemsize
                        + k_cols * out_cols * x_itemsize
                        + out_cols * 4),
    )

    out_packed = pl.pallas_call(
        _proj_kernel,
        out_shape=jax.ShapeDtypeStruct((n_packed, out_cols), out_dtype),
        grid_spec=pltpu.PrefetchScalarGridSpec(
            num_scalar_prefetch=0,
            grid=grid,
            in_specs=[
                pl.BlockSpec((tm_p, k_cols), lambda i: (i, 0)),       # pixels
                pl.BlockSpec((k_cols, out_cols), lambda i: (0, 0)),   # resident W
                pl.BlockSpec((1, out_cols), lambda i: (0, 0)),        # resident b
            ],
            out_specs=pl.BlockSpec((tm_p, out_cols), lambda i: (i, 0)),
        ),
        compiler_params=pltpu.CompilerParams(
            dimension_semantics=("parallel",),
            vmem_limit_bytes=int(vmem_budget_bytes),
        ),
        cost_estimate=cost,
    )(x_packed, w_blk, b_blk)

    out = out_packed.reshape(n_pad_rows, embed_dim)       # layout-free un-pack
    if n_pad_rows != n_rows:
        out = out[:n_rows]
    return out


if __name__ == "__main__":
    # Small deterministic setup consistent with the module:
    #   patch_size=4 -> nb_pixels=16, embed_dim=128 (lane-dense output),
    #   x: batch=2, 100 patch-rows per sample -> N = 200 flattened rows.
    patch_size = 4
    nb_pixels = patch_size ** 2
    embed_dim = 128
    B, T = 2, 100

    # Spectrum metadata (unused by forward, kept for parity with __init__).
    spectrum_spec = {
        "name": "visible",
        "min_wavelength": 400.0,
        "max_wavelength": 700.0,
        "sensors": ["S2"],
    }
    _ = spectrum_spec  # TODO(synk): metadata only, no compute to translate.

    key = jax.random.PRNGKey(0)
    kx, kw, kb = jax.random.split(key, 3)
    x = jax.random.normal(kx, (B, T, nb_pixels), dtype=jnp.float32)
    weight = jax.random.normal(kw, (embed_dim, nb_pixels), dtype=jnp.float32) * 0.05
    bias = jax.random.normal(kb, (embed_dim,), dtype=jnp.float32) * 0.01

    # Plain-JAX reference: y = x.view(-1, nb_pixels) @ W^T + b
    x_flat = x.reshape(-1, nb_pixels)
    ref = jnp.dot(x_flat, weight.T, preferred_element_type=jnp.float32) + bias[None, :]

    # 1) Default config: packed lane-dense path, big tiles, grid >= 2.
    out = jax.block_until_ready(spectrum_range_projection(x, weight, bias))
    np.testing.assert_allclose(np.asarray(out), np.asarray(ref), rtol=1e-5, atol=1e-5)
    assert out.shape == (B * T, embed_dim)

    # 2) Small tiles -> multi-step grid with a masked ragged tail.
    out_small = jax.block_until_ready(
        spectrum_range_projection(x, weight, bias, tile_m=64))
    np.testing.assert_allclose(np.asarray(out_small), np.asarray(ref),
                               rtol=1e-5, atol=1e-5)

    # 3) N not a multiple of the 8-row repack -> padded packed path.
    x_odd = jax.random.normal(kx, (B, T + 1, nb_pixels), dtype=jnp.float32)
    ref_odd = (jnp.dot(x_odd.reshape(-1, nb_pixels), weight.T,
                       preferred_element_type=jnp.float32) + bias[None, :])
    out_odd = jax.block_until_ready(spectrum_range_projection(x_odd, weight, bias))
    np.testing.assert_allclose(np.asarray(out_odd), np.asarray(ref_odd),
                               rtol=1e-5, atol=1e-5)

    # 4) bf16 output (halves HBM write traffic); accumulation stays f32.
    out_bf16 = jax.block_until_ready(
        spectrum_range_projection(x, weight, bias, out_dtype=jnp.bfloat16))
    assert out_bf16.dtype == jnp.bfloat16
    np.testing.assert_allclose(np.asarray(out_bf16.astype(jnp.float32)),
                               np.asarray(ref), rtol=5e-2, atol=5e-2)

    print("KERNEL_OK")
</pallas_src>

<mosaic_0001>
module attributes {stable_mosaic.version = 11 : i64} {
  func.func @_proj_kernel(%arg0: i32, %arg1: memref<16x128xf32, #tpu.memory_space<vmem>>, %arg2: memref<128x1024xf32, #tpu.memory_space<vmem>>, %arg3: memref<1x1024xf32, #tpu.memory_space<vmem>>, %arg4: memref<16x1024xf32, #tpu.memory_space<vmem>>) attributes {dimension_semantics = [#tpu.dimension_semantics<parallel>], iteration_bounds = array<i64: 2>, scalar_prefetch = 0 : i64, scratch_operands = 0 : i64, tpu.core_type = #tpu.core_type<tc>, window_params = [{transform_indices = @transform_0, window_bounds = array<i64: 16, 128>}, {pipeline_mode = #tpu.pipeline_mode<synchronous>, transform_indices = @transform_1, window_bounds = array<i64: 128, 1024>}, {pipeline_mode = #tpu.pipeline_mode<synchronous>, transform_indices = @transform_2, window_bounds = array<i64: 1, 1024>}, {transform_indices = @transform_3, window_bounds = array<i64: 16, 1024>}]} {
    %c0 = arith.constant 0 : index
    %c0_0 = arith.constant 0 : index
    %0 = vector.load %arg1[%c0, %c0_0] : memref<16x128xf32, #tpu.memory_space<vmem>>, vector<16x128xf32>
    %c0_1 = arith.constant 0 : index
    %c0_2 = arith.constant 0 : index
    %1 = vector.load %arg2[%c0_1, %c0_2] : memref<128x1024xf32, #tpu.memory_space<vmem>>, vector<128x1024xf32>
    %cst = arith.constant dense<0.000000e+00> : vector<16x1024xf32>
    %2 = tpu.matmul %0, %1, %cst {dimension_numbers = #tpu.dot_dimension_numbers<[1], [0], [0], [1], [0, 0, 1, 1], [], []>} : vector<16x128xf32>, vector<128x1024xf32>, vector<16x1024xf32> -> vector<16x1024xf32>
    %c0_3 = arith.constant 0 : index
    %c0_4 = arith.constant 0 : index
    %3 = vector.load %arg3[%c0_3, %c0_4] : memref<1x1024xf32, #tpu.memory_space<vmem>>, vector<1x1024xf32>
    %4 = vector.broadcast %3 : vector<1x1024xf32> to vector<16x1024xf32>
    %5 = arith.addf %2, %4 : vector<16x1024xf32>
    %c0_5 = arith.constant 0 : index
    %c0_6 = arith.constant 0 : index
    %6 = vector.load %arg4[%c0_5, %c0_6] : memref<16x1024xf32, #tpu.memory_space<vmem>>, vector<16x1024xf32>
    tpu.vector_store %arg4[%c0_5, %c0_6], %5 {strides = array<i32>} : memref<16x1024xf32, #tpu.memory_space<vmem>>, vector<16x1024xf32>,
    return
  }
  func.func @transform_0(%arg0: i32) -> (i32, i32) {
    %c0_i32 = arith.constant 0 : i32
    %c0_i32_0 = arith.constant 0 : i32
    return %arg0, %c0_i32 : i32, i32
  }
  func.func @transform_1(%arg0: i32) -> (i32, i32) {
    %c0_i32 = arith.constant 0 : i32
    %c0_i32_0 = arith.constant 0 : i32
    %c0_i32_1 = arith.constant 0 : i32
    return %c0_i32, %c0_i32_0 : i32, i32
  }
  func.func @transform_2(%arg0: i32) -> (i32, i32) {
    %c0_i32 = arith.constant 0 : i32
    %c0_i32_0 = arith.constant 0 : i32
    %c0_i32_1 = arith.constant 0 : i32
    return %c0_i32, %c0_i32_0 : i32, i32
  }
  func.func @transform_3(%arg0: i32) -> (i32, i32) {
    %c0_i32 = arith.constant 0 : i32
    %c0_i32_0 = arith.constant 0 : i32
    return %arg0, %c0_i32 : i32, i32
  }
}

</mosaic_0001>

<bundles_post_ra>
// kernel: tpu_custom_call.1
= control target key start
LH: loop header
LB: loop body
LE: loop exit
PB: predicated region body
PF: predicated region fallthrough
CT: control target
= control target key end

     0   :  { %8 = vsyncpa [#allocation3], 0  ;;  %s1141_s0 = inlined_call_operand.hbm [shape: f32[25,128], index: 0, kind: input, shape index: {}]   ;;  %s1142_s1 = inlined_call_operand.hbm [shape: f32[128,1024], index: 1, kind: input, shape index: {}]   ;;  %s1143_s2 = inlined_call_operand.hbm [shape: f32[1,1024], index: 2, kind: input, shape index: {}]   ;;  %s1144_s3 = inlined_call_operand.hbm [shape: f32[25,1024], index: 3, kind: output, shape index: {}]  }
   0x1   :  { %10 = vsyncpa [#allocation3 + $0x1], 0 }
   0x2   :  { %11 = vsyncpa [#allocation6], 0 }
   0x3   :  { %12 = vsyncpa [#allocation4], 0 }
   0x4   :  { %14 = vsyncpa [#allocation4 + $0x1], 0  ;;  %s966_s12 = smov 0   ;;  %s968_s13 = smov 0  }
   0x5   :  { %s970_s14 = smov 0   ;;  %s972_s15 = smov 0  }
   0x6 LB: > { %s987_s16 = sadd.s32 4294967295, %s936_s15   ;;  %s681_s17 = sadd.s32 4294967294, %s936_s15   ;;  %s936_s15 = sphi %s972_s15, %s1154_s15   ;;  %s932_s14 = sphi %s970_s14, %s1153_s14   ;;  %s928_s13 = sphi %s968_s13, %s1152_s13   ;;  %s924_s12 = sphi %s966_s12, %s1151_s12  }
   0x7   : > { %p40_p0 = scmp.ne.s32.totalorder %s928_s13, %s924_s12  ;;  %p41_p1 = scmp.eq.s32.totalorder %s987_s16, 0 }
   0x8   : > { %p106_p2 = scmp.eq.s32.totalorder %s987_s16, 1  ;;  %p112_p3 = scmp.eq.s32.totalorder %s681_s17, 1 }
   0x9   : > { %p996_p4 = por %p41_p1, %p40_p0  ;;  %p682_p5 = scmp.ge.s32.totalorder %s936_s15, 1 }
   0xa   : > { %p1001_p6 = por %p112_p3, %p40_p0  ;;  %p119_p7 = scmp.lt.s32.totalorder %s936_s15, 3 }
   0xb   : > { %s130_s22 = sshll.u32 %s1142_s1, 4  ;;  %s938_s24 = smov [#allocation5]   ;;  %s131_s22 = int_to_ptr.hbm [resolvable:$true] %s130_s22 }
   0xc   : > { %p1009_p8 = pnand %p682_p5, %p119_p7  ;;  %s132_s25 = sshll.u32 %s938_s24, 4  ;;  %s133_s25 = int_to_ptr.vmem [resolvable:$true] %s132_s25 }
   0xd   : > { %s145_s28 = sshll.u32 %s1143_s2, 4  ;;  %s939_s29 = smov 1024   ;;  %s146_s28 = int_to_ptr.hbm [resolvable:$true] %s145_s28 }
   0xe   : > { %p715_p9 = pneg %p1009_p8  ;;  %s940_s30 = smov 64  }
   0xf   : > { %s941_s4 = smov [#allocation7]   ;;  %s1022_s6 = sadd.s32 1, %s936_s15  }
  0x10   : > { %p716_p10 = pnand %p715_p9, %p41_p1  ;;  %s147_s5 = sshll.u32 %s941_s4, 4  ;;  %s148_s5 = int_to_ptr.vmem [resolvable:$true] %s147_s5 }
  0x11   : > { %s27_s7 = sadd.s32 1, %s932_s14  ;;  %s24_s8 = ssub.s32 %s936_s15, %s1022_s6 }
  0x12   : > { %718 = dma.hbm_to_vmem [thread:$0]  (!%p716_p10), %s131_s22, 16384, %s133_s25, [#allocation6], %s939_s29, %s939_s29, %s940_s30  }
  0x13   : > { %721 = dma.hbm_to_vmem [thread:$0]  (!%p716_p10), %s146_s28, 128, %s148_s5, [#allocation6]  }
  0x14   : > { %p34_p12 = scmp.ne.s32.totalorder %s932_s14, %s928_s13  ;;  %p25_p13 = scmp.eq.s32.totalorder %s24_s8, 0 }
  0x15   : > { %p35_p0 = scmp.eq.s32.totalorder %s936_s15, 0  ;;  %p732_p5 = scmp.lt.s32.totalorder %s936_s15, 2 }
  0x16   : > { %p1032_p3 = por %p106_p2, %p34_p12  ;;  %s158_s11 = sand.u32 1, %s932_s14  }
  0x17   : > { %s1038_s10 = scalar_select %p25_p13, %s932_s14, %s27_s7  }
  0x18   : > { %p36_p7 = por %p35_p0, %p34_p12  ;;  %s686_s17 = sshll.u32 %s158_s11, 4 }
  0x19   : > { %s700_s20 = sshll.u32 %s936_s15, 4  ;;  %s162_s25 = scalar_lea.vmem [#allocation2], %s686_s17 }
  0x1a   : > { %s167_s24 = scalar_lea.hbm %s1141_s0, %s700_s20  ;;  %s170_s26 = sshll.u32 %s162_s25, 4  ;;  %s171_s26 = int_to_ptr.vmem [resolvable:$true] %s170_s26 }
  0x1b   : > { %s168_s27 = sshll.u32 %s167_s24, 4  ;;  %p1045_p2 = pnand %p732_p5, %p36_p7  ;;  %s169_s27 = int_to_ptr.hbm [resolvable:$true] %s168_s27 }
  0x1c   : > { %s159_s29 = scalar_lea.sflag [#allocation3], %s158_s11  ;;  %s836_s30 = sshra.s32 %s169_s27, 4  ;;  %s837_s30 = int_to_ptr.hbm [resolvable:$true] %s836_s30 }
  0x1d   : > { %s838_s4 = scalar_lea.hbm %s837_s30, 16  ;;  %p840_p10 = pneg %p1045_p2 }
  0x1e   : > { %p839_p9 = scmp.ne.s32.totalorder %s837_s30, %s838_s4  ;;  %s843_s8 = scalar_lea.hbm %s1141_s0, 32 }
  0x1f   : > { %p844_p0 = scmp.lt.s32.totalorder %s837_s30, %s1141_s0  ;;  %p845_p5 = scmp.lt.s32.totalorder %s843_s8, %s838_s4 }
  0x20   : > { %p841_p12 = pnand %p840_p10, %p839_p9 }
  0x21   : > { %p846_p7 = por %p845_p5, %p844_p0 }
  0x22   : > { %p842_p13 = pneg %p841_p12 }
  0x24   : > { %p847_p11 = pnand %p846_p7, %p842_p13 }
  0x26   : > { %850 = shalt.err (!%p847_p11)
}
  0x27   : > { %s942_s11 = smov 128   ;;  %s943_s21 = smov 8  }
  0x28   : > { %725 = dma.hbm_to_vmem [thread:$0]  (!%p1045_p2), %s169_s27, 256, %s171_s26, %s159_s29, %s942_s11, %s942_s11, %s943_s21  }
  0x29   : > { %182 = sbr.rel (%p1009_p8) target bundleno = 264 (0x108), region = 32  ;;  %s1062_s22 = sand.u32 (!%p1009_p8), 1, %s928_s13  }
  0x2a   : > { %s690_s24 = sshll.u32 (!%p1009_p8), %s1062_s22, 4  ;;  %s185_s25 = scalar_lea.sflag (!%p1009_p8), [#allocation3], %s1062_s22 }
  0x2b   : > { %s1066_s30 = scalar_lea.vmem (!%p1009_p8), [#allocation2], %s690_s24 }
  0x2e   : > { %911 = dma.done.wait (%p996_p4), %s185_s25, 256  }
  0x2f   : > { %913 = vsyncadd (%p996_p4), %s185_s25, 4294967040 }
  0x30   : > { %915 = dma.done.wait (%p41_p1), [#allocation6], 16512  }
  0x31   : > { %917 = vsyncadd (%p41_p1), [#allocation6], 4294950784  ;;  %v348_v0 = vld [vmem:[#allocation5 + $0x3d0] sm:$0xff]  ;;  %v349_v1 = vld [vmem:[#allocation5 + $0x3d8] sm:$0xff]  ;;  %s693_s18 = sshll.u32 %s1062_s22, 7  ;;  %s702_s26 = sshll.u32 %s987_s16, 7 }
  0x32   : > { %v340_v2 = vld [vmem:[#allocation5 + $0x390] sm:$0xff]  ;;  %418 = vmatpush.msra.mxu2 %v348_v0  ;;  %441 = vmatpush.msra.mxu3 %v349_v1  ;;  %v341_v3 = vld [vmem:[#allocation5 + $0x398] sm:$0xff]  ;;  %v346_v6 = vld [vmem:[#allocation5 + $0x3c0] sm:$0xff]  ;;  %s1089_s23 = scalar_lea.vmem [#allocation8], %s693_s18  ;;  %s585_s29 = scalar_lea.hbm %s1144_s3, %s702_s26 }
  0x33   : > { %v332_v4 = vld [vmem:[#allocation5 + $0x350] sm:$0xff]  ;;  %v333_v5 = vld [vmem:[#allocation5 + $0x358] sm:$0xff]  ;;  %v347_v7 = vld [vmem:[#allocation5 + $0x3c8] sm:$0xff]  ;;  %372 = vmatpush.msra.mxu0 %v346_v6  ;;  %s586_s4 = sshll.u32 %s1089_s23, 4  ;;  %s588_s5 = sshll.u32 %s585_s29, 4  ;;  %s587_s4 = int_to_ptr.vmem [resolvable:$true] %s586_s4  ;;  %s589_s5 = int_to_ptr.hbm [resolvable:$true] %s588_s5 }
  0x34   : > { %419 = vmatpush.msra.mxu2 %v340_v2  ;;  %442 = vmatpush.msra.mxu3 %v341_v3  ;;  %v338_v8 = vld [vmem:[#allocation5 + $0x380] sm:$0xff]  ;;  %v339_v9 = vld [vmem:[#allocation5 + $0x388] sm:$0xff]  ;;  %v324_v10 = vld [vmem:[#allocation5 + $0x310] sm:$0xff]  ;;  %s573_s16 = scalar_lea.sflag [#allocation4], %s1062_s22  ;;  %s880_s7 = sshra.s32 %s589_s5, 4  ;;  %s881_s7 = int_to_ptr.hbm [resolvable:$true] %s880_s7 }
  0x35   : > { %395 = vmatpush.msra.mxu1 %v347_v7  ;;  %v325_v11 = vld [vmem:[#allocation5 + $0x318] sm:$0xff]  ;;  %v330_v12 = vld [vmem:[#allocation5 + $0x340] sm:$0xff]  ;;  %v331_v13 = vld [vmem:[#allocation5 + $0x348] sm:$0xff]  ;;  %373 = vmatpush.msra.mxu0 %v338_v8  ;;  %s882_s8 = scalar_lea.hbm %s881_s7, 128  ;;  %s886_s11 = scalar_lea.hbm %s1144_s3, 256 }
  0x36   : > { %420 = vmatpush.msra.mxu2 %v332_v4  ;;  %443 = vmatpush.msra.mxu3 %v333_v5  ;;  %v316_v14 = vld [vmem:[#allocation5 + $0x2d0] sm:$0xff]  ;;  %v317_v15 = vld [vmem:[#allocation5 + $0x2d8] sm:$0xff]  ;;  %v322_v16 = vld [vmem:[#allocation5 + $0x300] sm:$0xff]  ;;  %p883_p1 = scmp.ne.s32.totalorder %s881_s7, %s882_s8  ;;  %p887_p11 = scmp.lt.s32.totalorder %s881_s7, %s1144_s3 }
  0x37   : > { %396 = vmatpush.msra.mxu1 %v339_v9  ;;  %v323_v17 = vld [vmem:[#allocation5 + $0x308] sm:$0xff]  ;;  %374 = vmatpush.msra.mxu0 %v330_v12  ;;  %v308_v18 = vld [vmem:[#allocation5 + $0x290] sm:$0xff]  ;;  %v309_v19 = vld [vmem:[#allocation5 + $0x298] sm:$0xff]  ;;  %p888_p2 = scmp.lt.s32.totalorder %s886_s11, %s882_s8 }
  0x38   : > { %421 = vmatpush.msra.mxu2 %v324_v10  ;;  %444 = vmatpush.msra.mxu3 %v325_v11  ;;  %v314_v20 = vld [vmem:[#allocation5 + $0x2c0] sm:$0xff]  ;;  %v315_v21 = vld [vmem:[#allocation5 + $0x2c8] sm:$0xff]  ;;  %v300_v22 = vld [vmem:[#allocation5 + $0x250] sm:$0xff]  ;;  %p884_p4 = pnand %p883_p1, %p1032_p3 }
  0x39   : > { %397 = vmatpush.msra.mxu1 %v331_v13  ;;  %375 = vmatpush.msra.mxu0 %v322_v16  ;;  %v301_v23 = vld [vmem:[#allocation5 + $0x258] sm:$0xff]  ;;  %v306_v24 = vld [vmem:[#allocation5 + $0x280] sm:$0xff]  ;;  %v307_v25 = vld [vmem:[#allocation5 + $0x288] sm:$0xff]  ;;  %p889_p9 = por %p888_p2, %p887_p11 }
  0x3a   : > { %422 = vmatpush.msra.mxu2 %v316_v14  ;;  %445 = vmatpush.msra.mxu3 %v317_v15  ;;  %v292_v26 = vld [vmem:[#allocation5 + $0x210] sm:$0xff]  ;;  %v293_v27 = vld [vmem:[#allocation5 + $0x218] sm:$0xff]  ;;  %v298_v28 = vld [vmem:[#allocation5 + $0x240] sm:$0xff]  ;;  %p885_p8 = pneg %p884_p4 }
  0x3b   : > { %398 = vmatpush.msra.mxu1 %v323_v17  ;;  %376 = vmatpush.msra.mxu0 %v314_v20  ;;  %v299_v29 = vld [vmem:[#allocation5 + $0x248] sm:$0xff]  ;;  %v284_v30 = vld [vmem:[#allocation5 + $0x1d0] sm:$0xff]  ;;  %v285_v31 = vld [vmem:[#allocation5 + $0x1d8] sm:$0xff] }
  0x3c   : > { %423 = vmatpush.msra.mxu2 %v308_v18  ;;  %446 = vmatpush.msra.mxu3 %v309_v19  ;;  %v290_v32 = vld [vmem:[#allocation5 + $0x200] sm:$0xff]  ;;  %v291_v33 = vld [vmem:[#allocation5 + $0x208] sm:$0xff]  ;;  %v276_v34 = vld [vmem:[#allocation5 + $0x190] sm:$0xff]  ;;  %p890_p10 = pnand %p889_p9, %p885_p8 }
  0x3d   : > { %399 = vmatpush.msra.mxu1 %v315_v21  ;;  %377 = vmatpush.msra.mxu0 %v306_v24  ;;  %v277_v35 = vld [vmem:[#allocation5 + $0x198] sm:$0xff]  ;;  %v282_v36 = vld [vmem:[#allocation5 + $0x1c0] sm:$0xff]  ;;  %v283_v37 = vld [vmem:[#allocation5 + $0x1c8] sm:$0xff] }
  0x3e   : > { %424 = vmatpush.msra.mxu2 %v300_v22  ;;  %447 = vmatpush.msra.mxu3 %v301_v23  ;;  %v268_v38 = vld [vmem:[#allocation5 + $0x150] sm:$0xff]  ;;  %v269_v39 = vld [vmem:[#allocation5 + $0x158] sm:$0xff]  ;;  %v274_v40 = vld [vmem:[#allocation5 + $0x180] sm:$0xff] }
  0x3f   : > { %400 = vmatpush.msra.mxu1 %v307_v25  ;;  %378 = vmatpush.msra.mxu0 %v298_v28  ;;  %v275_v41 = vld [vmem:[#allocation5 + $0x188] sm:$0xff]  ;;  %v260_v42 = vld [vmem:[#allocation5 + $0x110] sm:$0xff]  ;;  %v261_v43 = vld [vmem:[#allocation5 + $0x118] sm:$0xff] }
  0x40   : > { %425 = vmatpush.msra.mxu2 %v292_v26  ;;  %448 = vmatpush.msra.mxu3 %v293_v27  ;;  %v266_v44 = vld [vmem:[#allocation5 + $0x140] sm:$0xff]  ;;  %v267_v45 = vld [vmem:[#allocation5 + $0x148] sm:$0xff]  ;;  %v252_v46 = vld [vmem:[#allocation5 + $0xd0] sm:$0xff] }
  0x41   : > { %401 = vmatpush.msra.mxu1 %v299_v29  ;;  %379 = vmatpush.msra.mxu0 %v290_v32  ;;  %v253_v47 = vld [vmem:[#allocation5 + $0xd8] sm:$0xff]  ;;  %v258_v48 = vld [vmem:[#allocation5 + $0x100] sm:$0xff]  ;;  %v259_v49 = vld [vmem:[#allocation5 + $0x108] sm:$0xff] }
  0x42   : > { %426 = vmatpush.msra.mxu2 %v284_v30  ;;  %449 = vmatpush.msra.mxu3 %v285_v31  ;;  %v244_v50 = vld [vmem:[#allocation5 + $0x90] sm:$0xff]  ;;  %v245_v51 = vld [vmem:[#allocation5 + $0x98] sm:$0xff]  ;;  %v250_v52 = vld [vmem:[#allocation5 + $0xc0] sm:$0xff] }
  0x43   : > { %402 = vmatpush.msra.mxu1 %v291_v33  ;;  %380 = vmatpush.msra.mxu0 %v282_v36  ;;  %v251_v53 = vld [vmem:[#allocation5 + $0xc8] sm:$0xff]  ;;  %v236_v54 = vld [vmem:[#allocation5 + $0x50] sm:$0xff]  ;;  %v237_v55 = vld [vmem:[#allocation5 + $0x58] sm:$0xff] }
  0x44   : > { %427 = vmatpush.msra.mxu2 %v276_v34  ;;  %450 = vmatpush.msra.mxu3 %v277_v35  ;;  %v242_v56 = vld [vmem:[#allocation5 + $0x80] sm:$0xff]  ;;  %v243_v57 = vld [vmem:[#allocation5 + $0x88] sm:$0xff]  ;;  %v228_v58 = vld [vmem:[#allocation5 + $0x10] sm:$0xff] }
  0x45   : > { %403 = vmatpush.msra.mxu1 %v283_v37  ;;  %381 = vmatpush.msra.mxu0 %v274_v40  ;;  %v229_v59 = vld [vmem:[#allocation5 + $0x18] sm:$0xff]  ;;  %v352_v60 = vld [vmem:[#allocation5 + $0x3f0] sm:$0xff]  ;;  %v234_v62 = vld [vmem:[#allocation5 + $0x40] sm:$0xff] }
  0x46   : > { %428 = vmatpush.msra.mxu2 %v268_v38  ;;  %451 = vmatpush.msra.mxu3 %v269_v39  ;;  %v353_v61 = vld [vmem:[#allocation5 + $0x3f8] sm:$0xff]  ;;  %v235_v63 = vld [vmem:[#allocation5 + $0x48] sm:$0xff]  ;;  %v344_v0 = vld [vmem:[#allocation5 + $0x3b0] sm:$0xff] }
  0x47   : > { %404 = vmatpush.msra.mxu1 %v275_v41  ;;  %382 = vmatpush.msra.mxu0 %v266_v44  ;;  %v345_v1 = vld [vmem:[#allocation5 + $0x3b8] sm:$0xff]  ;;  %v226_v2 = vld [vmem:[#allocation5] sm:$0xff]  ;;  %v227_v3 = vld [vmem:[#allocation5 + $0x8] sm:$0xff] }
  0x48   : > { %429 = vmatpush.msra.mxu2 %v260_v42  ;;  %452 = vmatpush.msra.mxu3 %v261_v43  ;;  %v336_v4 = vld [vmem:[#allocation5 + $0x370] sm:$0xff]  ;;  %v337_v5 = vld [vmem:[#allocation5 + $0x378] sm:$0xff]  ;;  %v350_v6 = vld [vmem:[#allocation5 + $0x3e0] sm:$0xff] }
  0x49   : > { %405 = vmatpush.msra.mxu1 %v267_v45  ;;  %383 = vmatpush.msra.mxu0 %v258_v48  ;;  %v351_v7 = vld [vmem:[#allocation5 + $0x3e8] sm:$0xff]  ;;  %v328_v8 = vld [vmem:[#allocation5 + $0x330] sm:$0xff]  ;;  %v329_v9 = vld [vmem:[#allocation5 + $0x338] sm:$0xff] }
  0x4a   : > { %430 = vmatpush.msra.mxu2 %v252_v46  ;;  %453 = vmatpush.msra.mxu3 %v253_v47  ;;  %v342_v10 = vld [vmem:[#allocation5 + $0x3a0] sm:$0xff]  ;;  %v343_v11 = vld [vmem:[#allocation5 + $0x3a8] sm:$0xff]  ;;  %v320_v12 = vld [vmem:[#allocation5 + $0x2f0] sm:$0xff] }
  0x4b   : > { %406 = vmatpush.msra.mxu1 %v259_v49  ;;  %384 = vmatpush.msra.mxu0 %v250_v52  ;;  %v321_v13 = vld [vmem:[#allocation5 + $0x2f8] sm:$0xff]  ;;  %v334_v14 = vld [vmem:[#allocation5 + $0x360] sm:$0xff]  ;;  %v335_v15 = vld [vmem:[#allocation5 + $0x368] sm:$0xff] }
  0x4c   : > { %431 = vmatpush.msra.mxu2 %v244_v50  ;;  %454 = vmatpush.msra.mxu3 %v245_v51  ;;  %v312_v16 = vld [vmem:[#allocation5 + $0x2b0] sm:$0xff]  ;;  %v313_v17 = vld [vmem:[#allocation5 + $0x2b8] sm:$0xff]  ;;  %v326_v18 = vld [vmem:[#allocation5 + $0x320] sm:$0xff] }
  0x4d   : > { %407 = vmatpush.msra.mxu1 %v251_v53  ;;  %385 = vmatpush.msra.mxu0 %v242_v56  ;;  %v327_v19 = vld [vmem:[#allocation5 + $0x328] sm:$0xff]  ;;  %v304_v20 = vld [vmem:[#allocation5 + $0x270] sm:$0xff]  ;;  %v305_v21 = vld [vmem:[#allocation5 + $0x278] sm:$0xff] }
  0x4e   : > { %432 = vmatpush.msra.mxu2 %v236_v54  ;;  %455 = vmatpush.msra.mxu3 %v237_v55  ;;  %v318_v22 = vld [vmem:[#allocation5 + $0x2e0] sm:$0xff]  ;;  %v319_v23 = vld [vmem:[#allocation5 + $0x2e8] sm:$0xff]  ;;  %v296_v24 = vld [vmem:[#allocation5 + $0x230] sm:$0xff] }
  0x4f   : > { %408 = vmatpush.msra.mxu1 %v243_v57  ;;  %386 = vmatpush.msra.mxu0 %v234_v62  ;;  %v297_v25 = vld [vmem:[#allocation5 + $0x238] sm:$0xff]  ;;  %v1077_v26 = vld [vmem:[%s1066_s30] sm:$0xff]  ;;  %v311_v28 = vld [vmem:[#allocation5 + $0x2a8] sm:$0xff] }
  0x50   : > { %433 = vmatpush.msra.mxu2 %v228_v58  ;;  %456 = vmatpush.msra.mxu3 %v229_v59  ;;  %v310_v27 = vld [vmem:[#allocation5 + $0x2a0] sm:$0xff]  ;;  %v288_v29 = vld [vmem:[#allocation5 + $0x1f0] sm:$0xff]  ;;  %v289_v30 = vld [vmem:[#allocation5 + $0x1f8] sm:$0xff] }
  0x51   : > { %409 = vmatpush.msra.mxu1 %v235_v63  ;;  %387 = vmatpush.msra.mxu0 %v226_v2  ;;  %v302_v31 = vld [vmem:[#allocation5 + $0x260] sm:$0xff]  ;;  %v303_v32 = vld [vmem:[#allocation5 + $0x268] sm:$0xff]  ;;  %v280_v33 = vld [vmem:[#allocation5 + $0x1b0] sm:$0xff] }
  0x52   : > { %510 = vmatpush.msrb.mxu2 %v352_v60  ;;  %533 = vmatpush.msrb.mxu3 %v353_v61  ;;  %v281_v34 = vld [vmem:[#allocation5 + $0x1b8] sm:$0xff]  ;;  %v294_v35 = vld [vmem:[#allocation5 + $0x220] sm:$0xff]  ;;  %v295_v36 = vld [vmem:[#allocation5 + $0x228] sm:$0xff] }
  0x53   : > { %410 = vmatpush.msra.mxu1 %v227_v3  ;;  %464 = vmatpush.msrb.mxu0 %v350_v6  ;;  %v272_v37 = vld [vmem:[#allocation5 + $0x170] sm:$0xff]  ;;  %v273_v38 = vld [vmem:[#allocation5 + $0x178] sm:$0xff]  ;;  %v286_v39 = vld [vmem:[#allocation5 + $0x1e0] sm:$0xff] }
  0x54   : > { %511 = vmatpush.msrb.mxu2 %v344_v0  ;;  %534 = vmatpush.msrb.mxu3 %v345_v1  ;;  %v287_v40 = vld [vmem:[#allocation5 + $0x1e8] sm:$0xff]  ;;  %v264_v41 = vld [vmem:[#allocation5 + $0x130] sm:$0xff]  ;;  %v265_v42 = vld [vmem:[#allocation5 + $0x138] sm:$0xff] }
  0x55   : > { %487 = vmatpush.msrb.mxu1 %v351_v7  ;;  %465 = vmatpush.msrb.mxu0 %v342_v10  ;;  %v225_v43 = vld [vmem:[%s1066_s30 + $0x8] sm:$0xff]  ;;  %v278_v44 = vld [vmem:[#allocation5 + $0x1a0] sm:$0xff]  ;;  %v256_v46 = vld [vmem:[#allocation5 + $0xf0] sm:$0xff] }
  0x56   : > { %512 = vmatpush.msrb.mxu2 %v336_v4  ;;  %535 = vmatpush.msrb.mxu3 %v337_v5  ;;  %v279_v45 = vld [vmem:[#allocation5 + $0x1a8] sm:$0xff]  ;;  %v257_v47 = vld [vmem:[#allocation5 + $0xf8] sm:$0xff]  ;;  %v270_v48 = vld [vmem:[#allocation5 + $0x160] sm:$0xff] }
  0x57   : > { %488 = vmatpush.msrb.mxu1 %v343_v11  ;;  %466 = vmatpush.msrb.mxu0 %v334_v14  ;;  %v271_v49 = vld [vmem:[#allocation5 + $0x168] sm:$0xff]  ;;  %v248_v50 = vld [vmem:[#allocation5 + $0xb0] sm:$0xff]  ;;  %v249_v51 = vld [vmem:[#allocation5 + $0xb8] sm:$0xff] }
  0x58   : > { %513 = vmatpush.msrb.mxu2 %v328_v8  ;;  %536 = vmatpush.msrb.mxu3 %v329_v9  ;;  %v262_v52 = vld [vmem:[#allocation5 + $0x120] sm:$0xff]  ;;  %v263_v53 = vld [vmem:[#allocation5 + $0x128] sm:$0xff]  ;;  %v240_v54 = vld [vmem:[#allocation5 + $0x70] sm:$0xff] }
  0x59   : > { %489 = vmatpush.msrb.mxu1 %v335_v15  ;;  %467 = vmatpush.msrb.mxu0 %v326_v18  ;;  %v241_v55 = vld [vmem:[#allocation5 + $0x78] sm:$0xff]  ;;  %v254_v56 = vld [vmem:[#allocation5 + $0xe0] sm:$0xff]  ;;  %v255_v57 = vld [vmem:[#allocation5 + $0xe8] sm:$0xff] }
  0x5a   : > { %514 = vmatpush.msrb.mxu2 %v320_v12  ;;  %537 = vmatpush.msrb.mxu3 %v321_v13  ;;  %v232_v58 = vld [vmem:[#allocation5 + $0x30] sm:$0xff]  ;;  %v233_v59 = vld [vmem:[#allocation5 + $0x38] sm:$0xff]  ;;  %v246_v60 = vld [vmem:[#allocation5 + $0xa0] sm:$0xff] }
  0x5b   : > { %490 = vmatpush.msrb.mxu1 %v327_v19  ;;  %468 = vmatpush.msrb.mxu0 %v318_v22  ;;  %v247_v61 = vld [vmem:[#allocation5 + $0xa8] sm:$0xff]  ;;  %v238_v62 = vld [vmem:[#allocation5 + $0x60] sm:$0xff] }
  0x5c   : > { %515 = vmatpush.msrb.mxu2 %v312_v16  ;;  %538 = vmatpush.msrb.mxu3 %v313_v17  ;;  %v239_v63 = vld [vmem:[#allocation5 + $0x68] sm:$0xff]  ;;  %v230_v0 = vld [vmem:[#allocation5 + $0x20] sm:$0xff] }
  0x5d   : > { %491 = vmatpush.msrb.mxu1 %v319_v23  ;;  %434 = vmatmul.f32.vlgmr.msra.gmra.mxu2 %v1077_v26  ;;  %v231_v1 = vld [vmem:[#allocation5 + $0x28] sm:$0xff]  ;;  %v354_v2 = vld [vmem:[#allocation7] sm:$0xff] }
  0x5e   : > { %516 = vmatpush.msrb.mxu2 %v304_v20  ;;  %539 = vmatpush.msrb.mxu3 %v305_v21  ;;  %v358_v3 = vperm.slane %v354_v2, 2  ;;  %v356_v4 = vperm.slane %v354_v2, 0  ;;  %v357_v5 = vperm.slane %v354_v2, 1  ;;  %v359_v6 = vperm.slane %v354_v2, 3 }
  0x5f   : > { %457 = vmatmul.f32.vlgmr.msra.gmra.mxu3 %v1077_v26  ;;  %469 = vmatpush.msrb.mxu0 %v310_v27  ;;  %v360_v23 = vperm.slane %v354_v2, 4 }
  0x60   : > { %517 = vmatpush.msrb.mxu2 %v296_v24  ;;  %540 = vmatpush.msrb.mxu3 %v297_v25  ;;  %v361_v24 = vperm.slane %v354_v2, 5  ;;  %v362_v25 = vperm.slane %v354_v2, 6 }
  0x61   : > { %492 = vmatpush.msrb.mxu1 %v311_v28  ;;  %470 = vmatpush.msrb.mxu0 %v302_v31 }
  0x62   : > { %518 = vmatpush.msrb.mxu2 %v288_v29  ;;  %541 = vmatpush.msrb.mxu3 %v289_v30 }
  0x63   : > { %493 = vmatpush.msrb.mxu1 %v303_v32  ;;  %471 = vmatpush.msrb.mxu0 %v294_v35 }
  0x64   : > { %519 = vmatpush.msrb.mxu2 %v280_v33  ;;  %542 = vmatpush.msrb.mxu3 %v281_v34 }
  0x65   : > { %494 = vmatpush.msrb.mxu1 %v295_v36  ;;  %388 = vmatmul.f32.vlgmr.msra.gmra.mxu0 %v1077_v26 }
  0x66   : > { %520 = vmatpush.msrb.mxu2 %v272_v37  ;;  %543 = vmatpush.msrb.mxu3 %v273_v38 }
  0x67   : > { %411 = vmatmul.f32.vlgmr.msra.gmra.mxu1 %v1077_v26  ;;  %472 = vmatpush.msrb.mxu0 %v286_v39 }
  0x68   : > { %495 = vmatpush.msrb.mxu1 %v287_v40  ;;  %521 = vmatpush.msrb.mxu2 %v264_v41 }
  0x69   : > { %544 = vmatpush.msrb.mxu3 %v265_v42  ;;  %437 = vmatmul.f32.gmra.mxu2 %v225_v43 }
  0x6a   : > { %460 = vmatmul.f32.gmra.mxu3 %v225_v43  ;;  %473 = vmatpush.msrb.mxu0 %v278_v44 }
  0x6b   : > { %496 = vmatpush.msrb.mxu1 %v279_v45  ;;  %522 = vmatpush.msrb.mxu2 %v256_v46 }
  0x6c   : > { %545 = vmatpush.msrb.mxu3 %v257_v47  ;;  %474 = vmatpush.msrb.mxu0 %v270_v48 }
  0x6d   : > { %497 = vmatpush.msrb.mxu1 %v271_v49  ;;  %523 = vmatpush.msrb.mxu2 %v248_v50 }
  0x6e   : > { %546 = vmatpush.msrb.mxu3 %v249_v51  ;;  %475 = vmatpush.msrb.mxu0 %v262_v52 }
  0x6f   : > { %498 = vmatpush.msrb.mxu1 %v263_v53  ;;  %524 = vmatpush.msrb.mxu2 %v240_v54 }
  0x70   : > { %547 = vmatpush.msrb.mxu3 %v241_v55  ;;  %391 = vmatmul.f32.gmra.mxu0 %v225_v43 }
  0x71   : > { %414 = vmatmul.f32.gmra.mxu1 %v225_v43  ;;  %476 = vmatpush.msrb.mxu0 %v254_v56 }
  0x72   : > { %499 = vmatpush.msrb.mxu1 %v255_v57  ;;  %525 = vmatpush.msrb.mxu2 %v232_v58 }
  0x73   : > { %548 = vmatpush.msrb.mxu3 %v233_v59  ;;  %526 = vmatmul.f32.vlgmr.msrb.gmra.mxu2 %v1077_v26 }
  0x74   : > { %549 = vmatmul.f32.vlgmr.msrb.gmra.mxu3 %v1077_v26  ;;  %477 = vmatpush.msrb.mxu0 %v246_v60 }
  0x75   : > { %500 = vmatpush.msrb.mxu1 %v247_v61 }
  0x76   : > { %478 = vmatpush.msrb.mxu0 %v238_v62 }
  0x77   : > { %501 = vmatpush.msrb.mxu1 %v239_v63 }
  0x78   : > { %479 = vmatpush.msrb.mxu0 %v230_v0 }
  0x79   : > { %502 = vmatpush.msrb.mxu1 %v231_v1  ;;  %480 = vmatmul.f32.vlgmr.msrb.gmra.mxu0 %v1077_v26 }
  0x7a   : > { %503 = vmatmul.f32.vlgmr.msrb.gmra.mxu1 %v1077_v26  ;;  %v363_v26 = vperm.slane %v354_v2, 7 }
  0x7b   : > { %529 = vmatmul.f32.gmra.mxu2 %v225_v43 }
  0x7c   : > { %552 = vmatmul.f32.gmra.mxu3 %v225_v43 }
  0x81   : > { %483 = vmatmul.f32.gmra.mxu0 %v225_v43 }
  0x82   : > { %506 = vmatmul.f32.gmra.mxu1 %v225_v43 }
  0xe0   : > { %v435_v7 = vpop.f32.mrf.mxu2 }
  0xe1   : > { %v436_v11 = vadd.f32 %v435_v7, %v358_v3 }
  0xe2   : > { %v458_v8 = vpop.f32.mrf.mxu3  ;;  %v389_v9 = vpop.f32.mrf.mxu0 }
  0xe3   : > { %v390_v12 = vadd.f32 %v389_v9, %v356_v4  ;;  %v459_v14 = vadd.f32 %v458_v8, %v359_v6  ;;  %558 = vst [vmem:[%s1089_s23 + $0x10] sm:$0xff] %v436_v11 }
  0xe4   : > { %v412_v10 = vpop.f32.mrf.mxu1 }
  0xe5   : > { %v413_v13 = vadd.f32 %v412_v10, %v357_v5  ;;  %556 = vst [vmem:[%s1089_s23] sm:$0xff] %v390_v12 }
  0xe6   : > { %559 = vst [vmem:[%s1089_s23 + $0x18] sm:$0xff] %v459_v14 }
  0xe7   : > { %557 = vst [vmem:[%s1089_s23 + $0x8] sm:$0xff] %v413_v13 }
  0xec   : > { %v438_v15 = vpop.f32.mrf.mxu2 }
  0xed   : > { %v461_v16 = vpop.f32.mrf.mxu3  ;;  %v392_v17 = vpop.f32.mrf.mxu0  ;;  %v439_v19 = vadd.f32 %v438_v15, %v358_v3 }
  0xee   : > { %v415_v18 = vpop.f32.mrf.mxu1  ;;  %v393_v20 = vadd.f32 %v392_v17, %v356_v4  ;;  %v462_v22 = vadd.f32 %v461_v16, %v359_v6 }
  0xef   : > { %v416_v21 = vadd.f32 %v415_v18, %v357_v5  ;;  %566 = vst [vmem:[%s1089_s23 + $0x50] sm:$0xff] %v439_v19 }
  0xf0   : > { %564 = vst [vmem:[%s1089_s23 + $0x40] sm:$0xff] %v393_v20 }
  0xf1   : > { %565 = vst [vmem:[%s1089_s23 + $0x48] sm:$0xff] %v416_v21 }
  0xf2   : > { %567 = vst [vmem:[%s1089_s23 + $0x58] sm:$0xff] %v462_v22 }
  0xf6   : > { %v481_v27 = vpop.f32.mrf.mxu0  ;;  %v527_v31 = vpop.f32.mrf.mxu2 }
  0xf7   : > { %v504_v28 = vpop.f32.mrf.mxu1  ;;  %v482_v29 = vadd.f32 %v481_v27, %v360_v23  ;;  %v550_v32 = vpop.f32.mrf.mxu3  ;;  %v528_v33 = vadd.f32 %v527_v31, %v362_v25 }
  0xf8   : > { %v505_v30 = vadd.f32 %v504_v28, %v361_v24  ;;  %v551_v34 = vadd.f32 %v550_v32, %v363_v26 }
  0xf9   : > { %560 = vst [vmem:[%s1089_s23 + $0x20] sm:$0xff] %v482_v29 }
  0xfa   : > { %561 = vst [vmem:[%s1089_s23 + $0x28] sm:$0xff] %v505_v30 }
  0xfb   : > { %562 = vst [vmem:[%s1089_s23 + $0x30] sm:$0xff] %v528_v33 }
  0xfc   : > { %563 = vst [vmem:[%s1089_s23 + $0x38] sm:$0xff] %v551_v34 }
  0xfe   : > { %v484_v35 = vpop.f32.mrf.mxu0  ;;  %v530_v39 = vpop.f32.mrf.mxu2 }
  0xff   : > { %v507_v36 = vpop.f32.mrf.mxu1  ;;  %v485_v37 = vadd.f32 %v484_v35, %v360_v23  ;;  %v553_v40 = vpop.f32.mrf.mxu3  ;;  %v531_v41 = vadd.f32 %v530_v39, %v362_v25 }
 0x100   : > { %v508_v38 = vadd.f32 %v507_v36, %v361_v24  ;;  %v554_v42 = vadd.f32 %v553_v40, %v363_v26 }
 0x101   : > { %568 = vst [vmem:[%s1089_s23 + $0x60] sm:$0xff] %v485_v37 }
 0x102   : > { %569 = vst [vmem:[%s1089_s23 + $0x68] sm:$0xff] %v508_v38 }
 0x103   : > { %570 = vst [vmem:[%s1089_s23 + $0x70] sm:$0xff] %v531_v41 }
 0x104   : > { %571 = vst [vmem:[%s1089_s23 + $0x78] sm:$0xff] %v554_v42 }
 0x105   : > { %893 = shalt.err (!%p890_p10)
}
 0x106   : > { %s944_s22 = smov 1024   ;;  %s945_s25 = smov 64  }
 0x107   : > { %713 = dma.vmem_to_hbm [thread:$0]  (%p1032_p3), %s587_s4, 2048, %s589_s5, %s573_s16, %s944_s22, %s944_s22, %s945_s25  }
 0x108 PF: > { %s603_s30 = sand.u32 1, %s924_s12   ;;  %p1150_p12 = scmp.ge.s32.totalorder %s936_s15, 2 }
 0x109   : > { %s604_s18 = scalar_lea.sflag [#allocation4], %s603_s30 }
 0x10a   : > { %p727_p13 = pnand %p1150_p12, %p1001_p6 }
 0x10c   : > { %p728_p0 = pneg %p727_p13 }
 0x10e   : > { %919 = dma.done.wait (%p728_p0), %s604_s18, 2048  }
 0x10f   : > { %921 = vsyncadd (%p728_p0), %s604_s18, 4294965248  ;;  %p17_p5 = scmp.ge.s32.totalorder %s1022_s6, 4   ;;  %s1151_s12 = smov %s928_s13 }
 0x110   : > { %s1152_s13 = smov %s932_s14  ;;  %s1153_s14 = smov %s1038_s10 }
 0x111   : > { %s1154_s15 = smov %s1022_s6  ;;  %19 = sbr.rel (!%p17_p5) target bundleno = 6 (0x6), region = 85 }
 0x116   :  { %610 = vsyncpa [#allocation3], 1 }
 0x117   :  { %612 = vsyncpa [#allocation3 + $0x1], 1 }
 0x118   :  { %613 = vsyncpa [#allocation6], 1 }
 0x119   :  { %614 = vsyncpa [#allocation4], 1 }
 0x11a   :  { %616 = vsyncpa [#allocation4 + $0x1], 1 }

</bundles_post_ra>
